<compile_context>
chip_gen: v7x
topology: tpu7x:2x2x1
jax: 0.10.0
libtpu: 0.0.40
codegen_flags: <defaults>
</compile_context>

<pallas_src>
import functools

import numpy as np
import jax
import jax.numpy as jnp
from jax.experimental import pallas as pl
from jax.experimental.pallas import tpu as pltpu


# --------------------------------------------------------------------------- helpers
def build_interp_matrix(in_size: int, out_size: int) -> np.ndarray:
    """M (out_size, in_size) with M @ v == F.interpolate(v, mode='linear',
    align_corners=False) for a 1-D signal v of length in_size (upsampling only)."""
    assert out_size >= in_size, "only upsampling (res >= 1) is supported"
    M = np.zeros((out_size, in_size), dtype=np.float32)
    scale = in_size / out_size
    for j in range(out_size):
        src = scale * (j + 0.5) - 0.5
        if src < 0.0:
            src = 0.0
        x0 = min(int(np.floor(src)), in_size - 1)
        x1 = x0 + 1 if x0 < in_size - 1 else x0
        lam = src - x0
        M[j, x0] += 1.0 - lam
        M[j, x1] += lam
    return M


def gen_G(prop: float, lam: float, total_size: int, dx: float) -> np.ndarray:
    # TODO(synk): exact gen_G formula lives in Meta_SCMT (not shipped with the module);
    # using a deterministic 1-D Rayleigh-Sommerfeld-style propagation matrix stand-in.
    x = (np.arange(total_size) - (total_size - 1) / 2.0) * dx
    k = 2.0 * np.pi / lam
    r = np.sqrt(prop ** 2 + (x[:, None] - x[None, :]) ** 2)
    G = (dx * prop / (1j * lam)) * np.exp(1j * k * r) / (r ** 1.5)
    return G.astype(np.complex64)


def _pick_tile(total: int, target: int) -> int:
    """Largest multiple-of-128 divisor of `total` that is <= target (else full dim)."""
    if total <= target:
        return total
    t = (target // 128) * 128
    while t >= 128:
        if total % t == 0:
            return t
        t -= 128
    return total


# --------------------------------------------------------------------------- kernels
def phase_modulate_kernel(hp_ref, w1_ref, b1_ref, wh_ref, bh_ref, wl_ref, bl_ref,
                          interp_t_ref, e0r_ref, e0i_ref, e2_ref,
                          *, h_min, h_max, layers):
    # hp: (N,1)   w1/b1/wl: (1,P)   wh: (layers,P,P)   bh: (layers,1,P)   bl: (1,1)
    # interp_t: (N,T)   e0r/e0i: (1,T)   e2 out: (2,T) = [Re(E); Im(E)]
    hp = hp_ref[...]
    hs = 1.0 / (1.0 + jnp.exp(-hp)) * (h_max - h_min) + h_min            # (N,1) widths
    # Linear(1, P) + ReLU: input dim is 1 -> broadcasted outer product + bias.
    # TODO(synk): Meta_SCMT fitted `Model` activation assumed to be ReLU.
    x = jnp.maximum(hs * w1_ref[...] + b1_ref[...], 0.0)                 # (N, P)
    for l in range(layers):                                              # static unroll
        x = jnp.maximum(
            jnp.dot(x, wh_ref[l], preferred_element_type=jnp.float32) + bh_ref[l], 0.0)
    # Final Linear(P, 1): width-1 contraction on the VPU (avoid a 1-wide MXU pass).
    p = jnp.sum(x * wl_ref[...], axis=-1, keepdims=True) + bl_ref[...]   # (N, 1)
    # Linear interpolation N -> T, lane-dense result.
    # TODO(synk): switch to gather+lerp for very large N (dense (N,T) is mostly zeros).
    phase = jnp.sum(p * interp_t_ref[...], axis=0, keepdims=True)        # (1, T)
    c = jnp.cos(phase)
    s = jnp.sin(phase)
    e0r = e0r_ref[...]
    e0i = e0i_ref[...]
    e2_ref[0:1, :] = e0r * c - e0i * s       # Re(E0 * exp(i*phase))
    e2_ref[1:2, :] = e0r * s + e0i * c       # Im(E0 * exp(i*phase))


def prop_intensity_kernel(e2_ref, grt_ref, git_ref, if_ref, acc_r_ref, acc_i_ref):
    # Transposed formulation so everything is lane-dense:  Ef^T = E^T @ G^T.
    # e2 block: (2, TK) = [er; ei];  grt/git blocks: (TK, TR) bf16 tiles of Gr^T / Gi^T.
    # acc_r accumulates [er@GrT ; ei@GrT], acc_i accumulates [er@GiT ; ei@GiT].
    k = pl.program_id(1)

    @pl.when(k == 0)
    def _():
        acc_r_ref[...] = jnp.zeros_like(acc_r_ref)
        acc_i_ref[...] = jnp.zeros_like(acc_i_ref)

    e2 = e2_ref[...].astype(grt_ref.dtype)                               # (2, TK) bf16
    acc_r_ref[...] += jnp.dot(e2, grt_ref[...], preferred_element_type=jnp.float32)
    acc_i_ref[...] += jnp.dot(e2, git_ref[...], preferred_element_type=jnp.float32)

    @pl.when(k == pl.num_programs(1) - 1)
    def _():
        a = acc_r_ref[...]
        b = acc_i_ref[...]
        efr = a[0:1, :] - b[1:2, :]            # Re(G @ E)^T  (1, TR)
        efi = a[1:2, :] + b[0:1, :]            # Im(G @ E)^T  (1, TR)
        if_ref[...] = efr * efr + efi * efi    # |Ef|^2, lane-dense unmasked store


# --------------------------------------------------------------------------- wrappers
_VMEM = pl.BlockSpec(memory_space=pltpu.MemorySpace.VMEM)


def run_phase_modulate(h_paras, w1, b1, wh, bh, wl, bl, interp_t, e0r, e0i,
                       *, h_min, h_max, layers):
    T = interp_t.shape[1]
    kernel = functools.partial(phase_modulate_kernel,
                               h_min=h_min, h_max=h_max, layers=layers)
    return pl.pallas_call(
        kernel,
        out_shape=jax.ShapeDtypeStruct((2, T), jnp.float32),
        in_specs=[_VMEM] * 10,
        out_specs=_VMEM,
    )(h_paras, w1, b1, wh, bh, wl, bl, interp_t, e0r, e0i)


def run_prop_intensity(grt, git, e2, *, tile_r=256, tile_k=1024):
    T = grt.shape[0]
    tr = _pick_tile(T, tile_r)     # output (lane) tile of If / Ef
    tk = _pick_tile(T, tile_k)     # contraction tile
    grid = (T // tr, T // tk)      # reduction axis last, marked 'arbitrary'
    bytes_g = 2 * T * T * grt.dtype.itemsize
    return pl.pallas_call(
        prop_intensity_kernel,
        out_shape=jax.ShapeDtypeStruct((1, T), jnp.float32),
        grid_spec=pltpu.PrefetchScalarGridSpec(
            num_scalar_prefetch=0,
            grid=grid,
            in_specs=[
                pl.BlockSpec((2, tk), lambda i, k: (0, k)),      # packed [er; ei]
                pl.BlockSpec((tk, tr), lambda i, k: (k, i)),     # Gr^T tile (bf16)
                pl.BlockSpec((tk, tr), lambda i, k: (k, i)),     # Gi^T tile (bf16)
            ],
            out_specs=pl.BlockSpec((1, tr), lambda i, k: (0, i)),
            scratch_shapes=[pltpu.VMEM((2, tr), jnp.float32),
                            pltpu.VMEM((2, tr), jnp.float32)],
        ),
        # Tiles are small enough for the default scoped-VMEM limit on all generations;
        # raise vmem_limit_bytes here if tile_r/tile_k are grown further.
        compiler_params=pltpu.CompilerParams(
            dimension_semantics=("parallel", "arbitrary")),
        cost_estimate=pl.CostEstimate(
            flops=8 * T * T, transcendentals=0,
            bytes_accessed=bytes_g + (grid[0] + 1) * 2 * T * 4 + T * 4),
    )(e2, grt, git)


# --------------------------------------------------------------------------- model
class PBAModelPallas:
    def __init__(self, prop_dis, gp, N, total_size, nodes, layers,
                 near_field=True, key=None, tile_r=256, tile_k=1024):
        assert total_size == gp['res'] * N, "E0 length must match interpolated phase"
        self.h_min = float(gp['h_min'])
        self.h_max = float(gp['h_max'])
        self.layers = int(layers)
        self.near_field = near_field
        self.tile_r = tile_r
        self.tile_k = tile_k

        key = jax.random.PRNGKey(0) if key is None else key
        ks = jax.random.split(key, 7)

        def uni(k, shape, fan_in):
            bound = 1.0 / np.sqrt(fan_in)
            return jax.random.uniform(k, shape, jnp.float32, -bound, bound)

        P = ((nodes + 127) // 128) * 128        # pad hidden width to MXU lane width
        self.nodes, self.nodes_pad = nodes, P

        # nn.Parameter h_paras (N,) -> stored as an (N,1) column of logits.
        # TODO(synk): the PyTorch model loads fitted gen_Phase weights from disk; here
        # they are randomly initialized (PyTorch Linear default init) instead.
        self.h_paras = jax.random.normal(ks[0], (N, 1), jnp.float32)
        # gen_Phase MLP weights, zero-padded nodes -> P (padding is exact: extra
        # channels stay zero through every ReLU layer and do not change the output).
        self.w1 = jnp.zeros((1, P), jnp.float32).at[:, :nodes].set(
            uni(ks[1], (1, nodes), 1))
        self.b1 = jnp.zeros((1, P), jnp.float32).at[:, :nodes].set(
            uni(ks[2], (1, nodes), 1))
        self.wh = jnp.zeros((layers, P, P), jnp.float32).at[:, :nodes, :nodes].set(
            uni(ks[3], (layers, nodes, nodes), nodes))
        self.bh = jnp.zeros((layers, 1, P), jnp.float32).at[:, :, :nodes].set(
            uni(ks[4], (layers, 1, nodes), nodes))
        self.wl = jnp.zeros((1, P), jnp.float32).at[:, :nodes].set(
            uni(ks[5], (1, nodes), nodes))
        self.bl = uni(ks[6], (1, 1), nodes)

        # Interpolation matrix stored transposed (N, T); propagation buffer G stored
        # transposed and in bf16 (HBM-bandwidth is the binding resource of the prop kernel).
        self.interp_t = jnp.asarray(build_interp_matrix(N, total_size).T)
        G = gen_G(prop_dis, gp['lam'], total_size, gp['dx'])
        self.GrT = jnp.asarray(np.ascontiguousarray(np.real(G).T), jnp.bfloat16)
        self.GiT = jnp.asarray(np.ascontiguousarray(np.imag(G).T), jnp.bfloat16)

    def __call__(self, e0r, e0i):
        e0r = jnp.asarray(e0r, jnp.float32).reshape(1, -1)
        e0i = jnp.asarray(e0i, jnp.float32).reshape(1, -1)
        e2 = run_phase_modulate(self.h_paras, self.w1, self.b1, self.wh, self.bh,
                                self.wl, self.bl, self.interp_t, e0r, e0i,
                                h_min=self.h_min, h_max=self.h_max, layers=self.layers)
        if self.near_field:
            return e2[0], e2[1]                      # (Re E, Im E), each (T,)
        If = run_prop_intensity(self.GrT, self.GiT, e2,
                                tile_r=self.tile_r, tile_k=self.tile_k)
        return If[0]                                 # |freelayer1(E)|^2, (T,)


# --------------------------------------------------------------------------- main
if __name__ == "__main__":
    N, res, nodes, layers = 8, 32, 32, 2
    T = res * N                                       # total_size = 256
    gp = dict(h_min=0.1, h_max=0.5, lam=1.0, dx=0.1, res=res)

    # Small tiles (128) are passed explicitly so the demo exercises the full 2-D grid
    # (2 row tiles x 2 contraction tiles); production defaults are 256 x 1024.
    model = PBAModelPallas(prop_dis=10.0, gp=gp, N=N, total_size=T,
                           nodes=nodes, layers=layers, near_field=True,
                           key=jax.random.PRNGKey(0), tile_r=128, tile_k=128)

    k1, k2 = jax.random.split(jax.random.PRNGKey(1))
    E0r = jax.random.normal(k1, (T,), jnp.float32)    # real part of incident field
    E0i = jax.random.normal(k2, (T,), jnp.float32)    # imag part of incident field

    # ---- near-field path: E = E0 * exp(1j * phase) --------------------------------
    Er, Ei = model(E0r, E0i)
    jax.block_until_ready((Er, Ei))

    # numpy (f64) reference of MLP -> interpolate -> modulate
    w1, b1 = np.asarray(model.w1, np.float64), np.asarray(model.b1, np.float64)
    wh, bh = np.asarray(model.wh, np.float64), np.asarray(model.bh, np.float64)
    wl, bl = np.asarray(model.wl, np.float64), np.asarray(model.bl, np.float64)
    hp = np.asarray(model.h_paras, np.float64)[:, 0]
    hs = 1.0 / (1.0 + np.exp(-hp)) * (gp['h_max'] - gp['h_min']) + gp['h_min']
    x = np.maximum(hs[:, None] * w1 + b1, 0.0)
    for l in range(layers):
        x = np.maximum(x @ wh[l] + bh[l], 0.0)
    p = (x * wl).sum(-1) + bl[0, 0]
    phase = build_interp_matrix(N, T).astype(np.float64) @ p
    e0r_n, e0i_n = np.asarray(E0r, np.float64), np.asarray(E0i, np.float64)
    er_ref = e0r_n * np.cos(phase) - e0i_n * np.sin(phase)
    ei_ref = e0r_n * np.sin(phase) + e0i_n * np.cos(phase)
    np.testing.assert_allclose(np.asarray(Er, np.float64), er_ref, rtol=5e-2, atol=5e-2)
    np.testing.assert_allclose(np.asarray(Ei, np.float64), ei_ref, rtol=5e-2, atol=5e-2)

    # ---- far-field path: If = |G @ E|^2 --------------------------------------------
    model.near_field = False
    If = model(E0r, E0i)
    jax.block_until_ready(If)

    # reference mirrors the kernel's bf16 storage of E / G (accumulation in f64)
    to64 = lambda a: np.asarray(
        jnp.asarray(a).astype(jnp.bfloat16).astype(jnp.float32), np.float64)
    er_b, ei_b = to64(Er), to64(Ei)
    grt = np.asarray(model.GrT.astype(jnp.float32), np.float64)
    git = np.asarray(model.GiT.astype(jnp.float32), np.float64)
    efr = er_b @ grt - ei_b @ git
    efi = ei_b @ grt + er_b @ git
    if_ref = efr * efr + efi * efi
    np.testing.assert_allclose(np.asarray(If, np.float64), if_ref,
                               rtol=1e-2, atol=1e-2 * float(if_ref.max()) + 1e-6)

    print("KERNEL_OK")
</pallas_src>

<mosaic_0001>
module attributes {stable_mosaic.version = 11 : i64} {
  func.func @phase_modulate_kernel(%arg0: memref<8x1xf32, #tpu.memory_space<vmem>>, %arg1: memref<1x128xf32, #tpu.memory_space<vmem>>, %arg2: memref<1x128xf32, #tpu.memory_space<vmem>>, %arg3: memref<2x128x128xf32, #tpu.memory_space<vmem>>, %arg4: memref<2x1x128xf32, #tpu.memory_space<vmem>>, %arg5: memref<1x128xf32, #tpu.memory_space<vmem>>, %arg6: memref<1x1xf32, #tpu.memory_space<vmem>>, %arg7: memref<8x256xf32, #tpu.memory_space<vmem>>, %arg8: memref<1x256xf32, #tpu.memory_space<vmem>>, %arg9: memref<1x256xf32, #tpu.memory_space<vmem>>, %arg10: memref<2x256xf32, #tpu.memory_space<vmem>>) attributes {dimension_semantics = [], scalar_prefetch = 0 : i64, scratch_operands = 0 : i64, tpu.core_type = #tpu.core_type<tc>} {
    %c0 = arith.constant 0 : index
    %c0_0 = arith.constant 0 : index
    %0 = vector.load %arg0[%c0, %c0_0] : memref<8x1xf32, #tpu.memory_space<vmem>>, vector<8x1xf32>
    %cst = arith.constant 0.000000e+00 : f32
    %1 = vector.broadcast %cst : f32 to vector<8x1xf32>
    %2 = arith.subf %1, %0 : vector<8x1xf32>
    %3 = math.exp %2 : vector<8x1xf32>
    %cst_1 = arith.constant 1.000000e+00 : f32
    %4 = vector.broadcast %cst_1 : f32 to vector<8x1xf32>
    %5 = arith.addf %4, %3 : vector<8x1xf32>
    %cst_2 = arith.constant 1.000000e+00 : f32
    %6 = vector.broadcast %cst_2 : f32 to vector<8x1xf32>
    %7 = arith.divf %6, %5 : vector<8x1xf32>
    %cst_3 = arith.constant 4.000000e-01 : f32
    %8 = vector.broadcast %cst_3 : f32 to vector<8x1xf32>
    %9 = arith.mulf %7, %8 : vector<8x1xf32>
    %cst_4 = arith.constant 1.000000e-01 : f32
    %10 = vector.broadcast %cst_4 : f32 to vector<8x1xf32>
    %11 = arith.addf %9, %10 : vector<8x1xf32>
    %c0_5 = arith.constant 0 : index
    %c0_6 = arith.constant 0 : index
    %12 = vector.load %arg1[%c0_5, %c0_6] : memref<1x128xf32, #tpu.memory_space<vmem>>, vector<1x128xf32>
    %13 = vector.broadcast %11 : vector<8x1xf32> to vector<8x128xf32>
    %14 = vector.broadcast %12 : vector<1x128xf32> to vector<8x128xf32>
    %15 = arith.mulf %13, %14 : vector<8x128xf32>
    %c0_7 = arith.constant 0 : index
    %c0_8 = arith.constant 0 : index
    %16 = vector.load %arg2[%c0_7, %c0_8] : memref<1x128xf32, #tpu.memory_space<vmem>>, vector<1x128xf32>
    %17 = vector.broadcast %16 : vector<1x128xf32> to vector<8x128xf32>
    %18 = arith.addf %15, %17 : vector<8x128xf32>
    %cst_9 = arith.constant 0.000000e+00 : f32
    %19 = vector.broadcast %cst_9 : f32 to vector<8x128xf32>
    %20 = arith.maximumf %18, %19 : vector<8x128xf32>
    %c0_10 = arith.constant 0 : index
    %c0_11 = arith.constant 0 : index
    %c0_12 = arith.constant 0 : index
    %21 = vector.load %arg3[%c0_10, %c0_11, %c0_12] : memref<2x128x128xf32, #tpu.memory_space<vmem>>, vector<1x128x128xf32>
    %22 = vector.shape_cast %21 : vector<1x128x128xf32> to vector<128x128xf32>
    %cst_13 = arith.constant dense<0.000000e+00> : vector<8x128xf32>
    %23 = tpu.matmul %20, %22, %cst_13 {dimension_numbers = #tpu.dot_dimension_numbers<[1], [0], [0], [1], [0, 0, 1, 1], [], []>} : vector<8x128xf32>, vector<128x128xf32>, vector<8x128xf32> -> vector<8x128xf32>
    %c0_14 = arith.constant 0 : index
    %c0_15 = arith.constant 0 : index
    %c0_16 = arith.constant 0 : index
    %24 = vector.load %arg4[%c0_14, %c0_15, %c0_16] : memref<2x1x128xf32, #tpu.memory_space<vmem>>, vector<1x1x128xf32>
    %25 = vector.shape_cast %24 : vector<1x1x128xf32> to vector<1x128xf32>
    %26 = vector.broadcast %25 : vector<1x128xf32> to vector<8x128xf32>
    %27 = arith.addf %23, %26 : vector<8x128xf32>
    %cst_17 = arith.constant 0.000000e+00 : f32
    %28 = vector.broadcast %cst_17 : f32 to vector<8x128xf32>
    %29 = arith.maximumf %27, %28 : vector<8x128xf32>
    %c1 = arith.constant 1 : index
    %c0_18 = arith.constant 0 : index
    %c0_19 = arith.constant 0 : index
    %30 = vector.load %arg3[%c1, %c0_18, %c0_19] : memref<2x128x128xf32, #tpu.memory_space<vmem>>, vector<1x128x128xf32>
    %31 = vector.shape_cast %30 : vector<1x128x128xf32> to vector<128x128xf32>
    %cst_20 = arith.constant dense<0.000000e+00> : vector<8x128xf32>
    %32 = tpu.matmul %29, %31, %cst_20 {dimension_numbers = #tpu.dot_dimension_numbers<[1], [0], [0], [1], [0, 0, 1, 1], [], []>} : vector<8x128xf32>, vector<128x128xf32>, vector<8x128xf32> -> vector<8x128xf32>
    %c1_21 = arith.constant 1 : index
    %c0_22 = arith.constant 0 : index
    %c0_23 = arith.constant 0 : index
    %33 = vector.load %arg4[%c1_21, %c0_22, %c0_23] : memref<2x1x128xf32, #tpu.memory_space<vmem>>, vector<1x1x128xf32>
    %34 = vector.shape_cast %33 : vector<1x1x128xf32> to vector<1x128xf32>
    %35 = vector.broadcast %34 : vector<1x128xf32> to vector<8x128xf32>
    %36 = arith.addf %32, %35 : vector<8x128xf32>
    %cst_24 = arith.constant 0.000000e+00 : f32
    %37 = vector.broadcast %cst_24 : f32 to vector<8x128xf32>
    %38 = arith.maximumf %36, %37 : vector<8x128xf32>
    %c0_25 = arith.constant 0 : index
    %c0_26 = arith.constant 0 : index
    %39 = vector.load %arg5[%c0_25, %c0_26] : memref<1x128xf32, #tpu.memory_space<vmem>>, vector<1x128xf32>
    %40 = vector.broadcast %39 : vector<1x128xf32> to vector<8x128xf32>
    %41 = arith.mulf %38, %40 : vector<8x128xf32>
    %cst_27 = arith.constant dense<0.000000e+00> : vector<8xf32>
    %42 = vector.multi_reduction <add>, %41, %cst_27 [1] : vector<8x128xf32> to vector<8xf32>
    %43 = vector.shape_cast %42 : vector<8xf32> to vector<8x1xf32>
    %c0_28 = arith.constant 0 : index
    %c0_29 = arith.constant 0 : index
    %44 = vector.load %arg6[%c0_28, %c0_29] : memref<1x1xf32, #tpu.memory_space<vmem>>, vector<1x1xf32>
    %45 = vector.broadcast %44 : vector<1x1xf32> to vector<8x1xf32>
    %46 = arith.addf %43, %45 : vector<8x1xf32>
    %c0_30 = arith.constant 0 : index
    %c0_31 = arith.constant 0 : index
    %47 = vector.load %arg7[%c0_30, %c0_31] : memref<8x256xf32, #tpu.memory_space<vmem>>, vector<8x256xf32>
    %48 = vector.broadcast %46 : vector<8x1xf32> to vector<8x256xf32>
    %49 = arith.mulf %48, %47 : vector<8x256xf32>
    %cst_32 = arith.constant dense<0.000000e+00> : vector<256xf32>
    %50 = vector.multi_reduction <add>, %49, %cst_32 [0] : vector<8x256xf32> to vector<256xf32>
    %51 = vector.shape_cast %50 : vector<256xf32> to vector<1x256xf32>
    %52 = math.cos %51 : vector<1x256xf32>
    %53 = math.sin %51 : vector<1x256xf32>
    %c0_33 = arith.constant 0 : index
    %c0_34 = arith.constant 0 : index
    %54 = vector.load %arg8[%c0_33, %c0_34] : memref<1x256xf32, #tpu.memory_space<vmem>>, vector<1x256xf32>
    %c0_35 = arith.constant 0 : index
    %c0_36 = arith.constant 0 : index
    %55 = vector.load %arg9[%c0_35, %c0_36] : memref<1x256xf32, #tpu.memory_space<vmem>>, vector<1x256xf32>
    %56 = arith.mulf %54, %52 : vector<1x256xf32>
    %57 = arith.mulf %55, %53 : vector<1x256xf32>
    %58 = arith.subf %56, %57 : vector<1x256xf32>
    %c0_37 = arith.constant 0 : index
    %c0_38 = arith.constant 0 : index
    %59 = vector.load %arg10[%c0_37, %c0_38] : memref<2x256xf32, #tpu.memory_space<vmem>>, vector<1x256xf32>
    tpu.vector_store %arg10[%c0_37, %c0_38], %58 {strides = array<i32>} : memref<2x256xf32, #tpu.memory_space<vmem>>, vector<1x256xf32>,
    %60 = arith.mulf %54, %53 : vector<1x256xf32>
    %61 = arith.mulf %55, %52 : vector<1x256xf32>
    %62 = arith.addf %60, %61 : vector<1x256xf32>
    %c1_39 = arith.constant 1 : index
    %c0_40 = arith.constant 0 : index
    %63 = vector.load %arg10[%c1_39, %c0_40] : memref<2x256xf32, #tpu.memory_space<vmem>>, vector<1x256xf32>
    tpu.vector_store %arg10[%c1_39, %c0_40], %62 {strides = array<i32>} : memref<2x256xf32, #tpu.memory_space<vmem>>, vector<1x256xf32>,
    return
  }
}

</mosaic_0001>

<bundles_post_ra>
// kernel: tpu_custom_call.1
= control target key start
LH: loop header
LB: loop body
LE: loop exit
PB: predicated region body
PF: predicated region fallthrough
CT: control target
= control target key end

     0   :  { %s1262_s0 = inlined_call_operand.vmem [shape: f32[8,1], index: 0, kind: input, shape index: {}]   ;;  %s1263_s1 = inlined_call_operand.vmem [shape: f32[1,128], index: 1, kind: input, shape index: {}]   ;;  %s1264_s2 = inlined_call_operand.vmem [shape: f32[1,128], index: 2, kind: input, shape index: {}]   ;;  %s1265_s3 = inlined_call_operand.hbm [shape: f32[2,128,128], index: 3, kind: input, shape index: {}]   ;;  %s1266_s4 = inlined_call_operand.vmem [shape: f32[2,1,128], index: 4, kind: input, shape index: {}]   ;;  %s1267_s5 = inlined_call_operand.vmem [shape: f32[1,128], index: 5, kind: input, shape index: {}]   ;;  %s1268_s6 = inlined_call_operand.<no memory space> [shape: f32[1,1], index: 6, kind: input, shape index: {}]   ;;  %s1269_s7 = inlined_call_operand.vmem [shape: f32[8,256], index: 7, kind: input, shape index: {}]   ;;  %s1270_s8 = inlined_call_operand.vmem [shape: f32[1,256], index: 8, kind: input, shape index: {}]   ;;  %s1271_s9 = inlined_call_operand.vmem [shape: f32[1,256], index: 9, kind: input, shape index: {}]   ;;  %s1272_s10 = inlined_call_operand.hbm [shape: f32[2,256], index: 10, kind: output, shape index: {}]  }
   0x1   :  { %v15_v0 = vstv %s1268_s6 }
   0x2   :  { %16 = vst [vmem:[#allocation2] sm:$0x1] %v15_v0 }
   0x3   :  { %17 = vsyncpa [#allocation4], 0 }
   0x4   :  { %18 = vsyncpa [#allocation5], 0  ;;  %s1052_s15 = smov [#allocation3]   ;;  %s1004_s19 = scalar_lea.hbm %s1265_s3, 4096 }
   0x5   :  { %s30_s16 = sshll.u32 %s1052_s15, 4  ;;  %p1005_p0 = scmp.ne.s32.totalorder %s1265_s3, %s1004_s19  ;;  %s31_s16 = int_to_ptr.vmem [resolvable:$true] %s30_s16 }
   0x6   :  { %p1008_p1 = scmp.lt.u32.totalorder %s1004_s19, %s1265_s3 }
   0x8   :  { %p1010_p2 = pnand %p1008_p1, %p1005_p0 }
   0xa   :  { %1013 = shalt.err (!%p1010_p2)
}
   0xb   :  { %s1014_s6 = scalar_lea.vmem %s31_s16, 4096  ;;  %p1019_p4 = scmp.lt.s32.totalorder %s31_s16, %s31_s16 }
   0xc   :  { %p1015_p3 = scmp.ne.s32.totalorder %s31_s16, %s1014_s6  ;;  %p1020_p5 = scmp.lt.s32.totalorder %s1014_s6, %s1014_s6 }
   0xe   :  { %p1021_p6 = por %p1020_p5, %p1019_p4 }
  0x10   :  { %p1022_p7 = pnand %p1021_p6, %p1015_p3 }
  0x12   :  { %1025 = shalt.err (!%p1022_p7)
}
  0x13   :  { %s1053_s24 = smov 128   ;;  %s1054_s25 = smov 8  }
  0x14   :  { %36 = dma.hbm_to_vmem [thread:$0]  %s1265_s3, 4096, %s31_s16, [#allocation4], %s1053_s24, %s1053_s24, %s1054_s25  }
  0x15   :  { %1048 = dma.done.wait [#allocation4], 4096  }
  0x16   :  { %1049 = vsyncadd [#allocation4], 4294963200  ;;  %v1055_v1 = vmov 0   ;;  %v1056_v2 = vmov 0.0|0.0   ;;  %v52_v3 = vld [vmem:[%s1262_s0] sm:$0xff]  ;;  %v84_v5 = vld [vmem:[#allocation3 + $0x8] sm:$0xff] }
  0x17   :  { %990 = vset.pattern.permute.xlu0 %v1055_v1  ;;  %919 = vmatprep.subr.bf16.mxu0 %v1056_v2  ;;  %v83_v4 = vld [vmem:[#allocation3] sm:$0xff]  ;;  %v53_v6 = vsub.f32 0.0, %v52_v3  ;;  %v85_v8 = vld [vmem:[#allocation3 + $0x10] sm:$0xff]  ;;  %v86_v9 = vld [vmem:[#allocation3 + $0x18] sm:$0xff]  ;;  %vm1057_vm0 = vmmov 0   ;;  %v1058_v35 = vmov 0.0  }
  0x18   :  { %943 = vmatprep.subr.bf16.mxu1 %v1056_v2  ;;  %991 = vset.pattern.permute.xlu1 %v1055_v1  ;;  %v920_v7 = vpack.c.bf16 %v84_v5, %v83_v4  ;;  %v923_v11 = vpack.c.bf16 %v86_v9, %v85_v8  ;;  %v87_v12 = vld [vmem:[#allocation3 + $0x20] sm:$0xff]  ;;  %v88_v13 = vld [vmem:[#allocation3 + $0x28] sm:$0xff]  ;;  %v89_v15 = vld [vmem:[#allocation3 + $0x30] sm:$0xff]  ;;  %s1066_s21 = smov [#allocation6]  }
  0x19   :  { %v54_v10 = vmul.f32 1.442695, %v53_v6  ;;  %v926_v14 = vpack.c.bf16 %v88_v13, %v87_v12  ;;  %v90_v16 = vld [vmem:[#allocation3 + $0x38] sm:$0xff]  ;;  %v91_v18 = vld [vmem:[#allocation3 + $0x40] sm:$0xff]  ;;  %v92_v19 = vld [vmem:[#allocation3 + $0x48] sm:$0xff]  ;;  %881 = vmatprep.mubr.msk.f32.mxu0 %vm1057_vm0, %v1058_v35  ;;  %916 = vmatprep.mubr.msk.f32.mxu1 %vm1057_vm0, %v1058_v35  ;;  %s783_s22 = sshll.u32 %s1066_s21, 4  ;;  %s784_s22 = int_to_ptr.vmem [resolvable:$true] %s783_s22 }
  0x1a   :  { %921 = vmatpush3.bf16.msra.mxu0 %v920_v7  ;;  %v929_v17 = vpack.c.bf16 %v90_v16, %v89_v15  ;;  %v932_v21 = vpack.c.bf16 %v92_v19, %v91_v18  ;;  %v93_v23 = vld [vmem:[#allocation3 + $0x50] sm:$0xff]  ;;  %v94_v24 = vld [vmem:[#allocation3 + $0x58] sm:$0xff]  ;;  %v95_v26 = vld [vmem:[#allocation3 + $0x60] sm:$0xff]  ;;  %s1026_s23 = scalar_lea.vmem %s784_s22, 64  ;;  %p1031_p9 = scmp.lt.s32.totalorder %s784_s22, %s784_s22 }
  0x1b   :  { %922 = vmatprep.subr.bf16.mxu0 %v1056_v2  ;;  %992 = vpow2.f32 %v54_v10  ;;  %v935_v25 = vpack.c.bf16 %v94_v24, %v93_v23  ;;  %v96_v27 = vld [vmem:[#allocation3 + $0x68] sm:$0xff]  ;;  %v97_v32 = vld [vmem:[#allocation3 + $0x70] sm:$0xff]  ;;  %v98_v33 = vld [vmem:[#allocation3 + $0x78] sm:$0xff]  ;;  %p1027_p8 = scmp.ne.s32.totalorder %s784_s22, %s1026_s23  ;;  %p1032_p10 = scmp.lt.s32.totalorder %s1026_s23, %s1026_s23 }
  0x1c   :  { %v938_v28 = vpack.c.bf16 %v96_v27, %v95_v26  ;;  %v941_v34 = vpack.c.bf16 %v98_v33, %v97_v32  ;;  %v178_v36 = vld [vmem:[#allocation3 + $0x80] sm:$0xff]  ;;  %v179_v37 = vld [vmem:[#allocation3 + $0x88] sm:$0xff]  ;;  %v180_v38 = vld [vmem:[#allocation3 + $0x90] sm:$0xff] }
  0x1d   :  { %v944_v39 = vpack.c.bf16 %v179_v37, %v178_v36  ;;  %v181_v40 = vld [vmem:[#allocation3 + $0x98] sm:$0xff]  ;;  %v182_v42 = vld [vmem:[#allocation3 + $0xa0] sm:$0xff]  ;;  %v183_v43 = vld [vmem:[#allocation3 + $0xa8] sm:$0xff]  ;;  %p1033_p11 = por %p1032_p10, %p1031_p9 }
  0x1e   :  { %924 = vmatpush3.bf16.msra.mxu0 %v923_v11  ;;  %v947_v41 = vpack.c.bf16 %v181_v40, %v180_v38  ;;  %v950_v44 = vpack.c.bf16 %v183_v43, %v182_v42  ;;  %v184_v45 = vld [vmem:[#allocation3 + $0xb0] sm:$0xff]  ;;  %v185_v46 = vld [vmem:[#allocation3 + $0xb8] sm:$0xff]  ;;  %v186_v48 = vld [vmem:[#allocation3 + $0xc0] sm:$0xff] }
  0x1f   :  { %925 = vmatprep.subr.bf16.mxu0 %v1056_v2  ;;  %945 = vmatpush3.bf16.msra.mxu1 %v944_v39  ;;  %v953_v47 = vpack.c.bf16 %v185_v46, %v184_v45  ;;  %v187_v49 = vld [vmem:[#allocation3 + $0xc8] sm:$0xff]  ;;  %v188_v51 = vld [vmem:[#allocation3 + $0xd0] sm:$0xff]  ;;  %v189_v52 = vld [vmem:[#allocation3 + $0xd8] sm:$0xff]  ;;  %p1034_p12 = pnand %p1033_p11, %p1027_p8 }
  0x20   :  { %946 = vmatprep.subr.bf16.mxu1 %v1056_v2  ;;  %v956_v50 = vpack.c.bf16 %v187_v49, %v186_v48  ;;  %v959_v53 = vpack.c.bf16 %v189_v52, %v188_v51  ;;  %v190_v54 = vld [vmem:[#allocation3 + $0xe0] sm:$0xff]  ;;  %v191_v55 = vld [vmem:[#allocation3 + $0xe8] sm:$0xff]  ;;  %v792_v57 = vld [vmem:[%s1263_s1] ss:$0 sm:$0xff] }
  0x21   :  { %v962_v56 = vpack.c.bf16 %v191_v55, %v190_v54  ;;  %v793_v58 = vld [vmem:[%s1264_s2] ss:$0 sm:$0xff]  ;;  %v192_v63 = vld [vmem:[#allocation3 + $0xf0] sm:$0xff]  ;;  %v796_v7 = vld [vmem:[%s1266_s4 + $0x1] ss:$0 sm:$0xff] }
  0x22   :  { %927 = vmatpush3.bf16.msra.mxu0 %v926_v14  ;;  %v193_v0 = vld [vmem:[#allocation3 + $0xf8] sm:$0xff]  ;;  %v292_v18 = vld [vmem:[%s1269_s7 + $0x8] sm:$0xff]  ;;  %v1059_v54 = vmov 683565275  }
  0x23   :  { %928 = vmatprep.subr.bf16.mxu0 %v1056_v2  ;;  %948 = vmatpush3.bf16.msra.mxu1 %v947_v41  ;;  %v965_v1 = vpack.c.bf16 %v193_v0, %v192_v63  ;;  %v797_v11 = vld [vmem:[%s1267_s5] ss:$0 sm:$0xff]  ;;  %v1063_v0 = vmov 920167782  }
  0x24   :  { %949 = vmatprep.subr.bf16.mxu1 %v1056_v2  ;;  %v798_v14 = vld [vmem:[#allocation2] ss:$0 sm:$0xff] }
  0x25   :  { %v993_v20 = vpop.eup %992 }
  0x26   :  { %930 = vmatpush3.bf16.msra.mxu0 %v929_v17  ;;  %v56_v22 = vadd.f32 1.0, %v993_v20  ;;  %v291_v17 = vld [vmem:[%s1269_s7] sm:$0xff] }
  0x27   :  { %931 = vmatprep.subr.bf16.mxu0 %v1056_v2  ;;  %951 = vmatpush3.bf16.msra.mxu1 %v950_v44 }
  0x28   :  { %994 = vrcp.f32 %v56_v22  ;;  %952 = vmatprep.subr.bf16.mxu1 %v1056_v2 }
  0x2a   :  { %933 = vmatpush3.bf16.msra.mxu0 %v932_v21 }
  0x2b   :  { %934 = vmatprep.subr.bf16.mxu0 %v1056_v2  ;;  %954 = vmatpush3.bf16.msra.mxu1 %v953_v47 }
  0x2c   :  { %955 = vmatprep.subr.bf16.mxu1 %v1056_v2 }
  0x2e   :  { %936 = vmatpush3.bf16.msra.mxu0 %v935_v25 }
  0x2f   :  { %937 = vmatprep.subr.bf16.mxu0 %v1056_v2  ;;  %957 = vmatpush3.bf16.msra.mxu1 %v956_v50 }
  0x30   :  { %958 = vmatprep.subr.bf16.mxu1 %v1056_v2 }
  0x32   :  { %939 = vmatpush3.bf16.msra.mxu0 %v938_v28  ;;  %v995_v29 = vpop.eup %994 }
  0x33   :  { %940 = vmatprep.subr.bf16.mxu0 %v1056_v2  ;;  %v59_v30 = vmul.f32 0.4, %v995_v29  ;;  %960 = vmatpush3.bf16.msra.mxu1 %v959_v53 }
  0x34   :  { %961 = vmatprep.subr.bf16.mxu1 %v1056_v2 }
  0x35   :  { %v60_v31 = vadd.f32 0.1, %v59_v30 }
  0x36   :  { %942 = vmatpush3.bf16.msra.mxu0 %v941_v34 }
  0x37   :  { %64 = vperm.xlu0 %990, %v60_v31   ;;  %963 = vmatpush3.bf16.msra.mxu1 %v962_v56 }
  0x38   :  { %964 = vmatprep.subr.bf16.mxu1 %v1056_v2  ;;  %v794_v2 = vld [vmem:[%s1266_s4] ss:$0 sm:$0xff] }
  0x3b   :  { %966 = vmatpush3.bf16.msra.mxu1 %v965_v1 }
  0xb6   :  { %v65_v59 = vpop.permute.xlu0 %64 }
  0xb7   :  { %v73_v60 = vmul.f32 %v792_v57, %v65_v59 }
  0xb9   :  { %v81_v61 = vadd.f32 %v793_v58, %v73_v60  ;;  %v1060_v58 = vmov 2475754826   ;;  %v1061_v60 = vmov 2131351028  }
  0xbb   :  { %v82_v62 = vmax.f32 %v81_v61, 0.0 }
  0xbd   :  { %882 = vmatmul.mubr.f32.vlgmr.msra.gmra.mrb[0].mxu0 %v82_v62  ;;  %v1062_v62 = vmov 2102212464  }
 0x190   :  { %v172_v3 = vpop.f32.mrb[0].mxu0 }
 0x191   :  { %v173_v4 = vadd.f32 %v794_v2, %v172_v3  ;;  %v883_v5 = vpop.f32.mrb[1].mxu0 }
 0x193   :  { %v176_v6 = vmax.f32 %v173_v4, 0.0 }
 0x195   :  { %917 = vmatmul.mubr.f32.vlgmr.msra.gmra.mrb[0].mxu1 %v176_v6 }
 0x268   :  { %v268_v8 = vpop.f32.mrb[0].mxu1 }
 0x269   :  { %v269_v9 = vadd.f32 %v796_v7, %v268_v8  ;;  %v918_v10 = vpop.f32.mrb[1].mxu1  ;;  %v1064_v7 = vmov 1326507024  }
 0x26b   :  { %v272_v12 = vmax.f32 %v269_v9, 0.0 }
 0x26d   :  { %v280_v13 = vmul.f32 %v797_v11, %v272_v12 }
 0x26f   :  { %281 = vadd.xlane.f32.xlu0 %v280_v13 }
 0x2fc   :  { %v282_v15 = vpop.xlane.xlu0 %281 }
 0x2fd   :  { %v290_v16 = vadd.f32 %v798_v14, %v282_v15 }
 0x2ff   :  { %295 = vperm.xlu1 %991, %v290_v16  }
 0x37e   :  { %v296_v19 = vpop.permute.xlu1 %295 }
 0x37f   :  { %v298_v20 = vmul.f32 %v296_v19, %v291_v17  ;;  %v299_v21 = vmul.f32 %v296_v19, %v292_v18 }
 0x381   :  { %v300_v22 = vrot.slane %v298_v20, 4  ;;  %v306_v23 = vrot.slane %v299_v21, 4 }
 0x383   :  { %v301_v24 = vadd.f32 %v300_v22, %v298_v20  ;;  %v307_v25 = vadd.f32 %v306_v23, %v299_v21 }
 0x385   :  { %v302_v26 = vrot.slane %v301_v24, 2  ;;  %v308_v27 = vrot.slane %v307_v25, 2 }
 0x387   :  { %v303_v28 = vadd.f32 %v302_v26, %v301_v24  ;;  %v309_v29 = vadd.f32 %v308_v27, %v307_v25 }
 0x389   :  { %v304_v30 = vrot.slane %v303_v28, 1  ;;  %v310_v31 = vrot.slane %v309_v29, 1 }
 0x38b   :  { %v1177_v32 = vadd.f32 %v304_v30, %v303_v28  ;;  %v1179_v33 = vadd.f32 %v310_v31, %v309_v29 }
 0x38d   :  { %v312_v34 = vand.u32 2147483647, %v1177_v32  ;;  %v315_v35 = vand.u32 2139095040, %v1177_v32  ;;  %v418_v36 = vand.u32 2139095040, %v1179_v33  ;;  %v415_v39 = vand.u32 2147483647, %v1179_v33 }
 0x38e   :  { %vm314_vm15 = vcmp.lt.s32.totalorder %v1177_v32, 0 }
 0x38f   :  { %v316_v37 = vshrl.u32 %v315_v35, 23  ;;  %v319_v38 = vand.u32 8388607, %v312_v34  ;;  %v419_v40 = vshrl.u32 %v418_v36, 23  ;;  %v1189_v45 = vand.u32 8388607, %v415_v39 }
 0x390   :  { %vm313_vm0 = vcmp.le.f32.partialorder %v312_v34, 0.7853982 }
 0x391   :  { %v799_v41 = vadd.s32 4294967169, %v316_v37  ;;  %v803_v42 = vadd.s32 4294967169, %v419_v40  ;;  %v320_v44 = vor.u32 8388608, %v319_v38  ;;  %v423_v52 = vor.u32 8388608, %v1189_v45 }
 0x393   :  { %v322_v43 = vadd.s32 1, %v799_v41  ;;  %v425_v46 = vadd.s32 1, %v803_v42  ;;  %v1191_v51 = vshll.u32 %v320_v44, 8 }
 0x395   :  { %vm323_vm1 = vcmp.gt.s32.totalorder %v322_v43, 0  ;;  %vm426_vm2 = vcmp.gt.s32.totalorder %v425_v46, 0 }
 0x396   :  { %v324_v47 = vsel %vm323_vm1, %v322_v43, 0  ;;  %v427_v50 = vsel %vm426_vm2, %v425_v46, 0  ;;  %v463_v46 = vshll.u32 %v423_v52, 8  ;;  %vm417_vm1 = vcmp.lt.s32.totalorder %v1179_v33, 0 }
 0x397   :  { %v325_v48 = vshrl.u32 %v324_v47, 5  ;;  %v326_v49 = vand.u32 31, %v324_v47  ;;  %v1194_v56 = vshrl.u32 %v427_v50, 5  ;;  %v429_v57 = vand.u32 31, %v427_v50 }
 0x398   :  { %vm416_vm2 = vcmp.le.f32.partialorder %v415_v39, 0.7853982 }
 0x399   :  { %v327_v53 = vsub.s32 32, %v326_v49  ;;  %v329_v55 = vshll.u32 %v1059_v54, %v326_v49  ;;  %v332_v59 = vshll.u32 %v1060_v58, %v326_v49  ;;  %v335_v61 = vshll.u32 %v1061_v60, %v326_v49 }
 0x39a   :  { %v338_v63 = vshll.u32 %v1062_v62, %v326_v49  ;;  %v341_v1 = vshll.u32 %v1063_v0, %v326_v49  ;;  %vm344_vm3 = vcmp.lt.s32.totalorder %v325_v48, 1  ;;  %vm345_vm4 = vcmp.lt.s32.totalorder %v325_v48, 2 }
 0x39b   :  { %v330_v2 = vshrl.u32 %v1060_v58, %v327_v53  ;;  %v333_v3 = vshrl.u32 %v1061_v60, %v327_v53  ;;  %v336_v4 = vshrl.u32 %v1062_v62, %v327_v53  ;;  %v328_v5 = vshrl.u32 %v1059_v54, %v327_v53 }
 0x39c   :  { %v339_v6 = vshrl.u32 %v1063_v0, %v327_v53  ;;  %v342_v8 = vshrl.u32 %v1064_v7, %v327_v53  ;;  %v430_v12 = vsub.s32 32, %v429_v57  ;;  %vm346_vm5 = vcmp.lt.s32.totalorder %v325_v48, 3 }
 0x39d   :  { %v331_v9 = vor.u32 %v330_v2, %v329_v55  ;;  %v334_v10 = vor.u32 %v333_v3, %v332_v59  ;;  %v337_v11 = vor.u32 %v336_v4, %v335_v61  ;;  %vm347_vm6 = vcmp.lt.s32.totalorder %v325_v48, 4 }
 0x39e   :  { %v340_v13 = vor.u32 %v339_v6, %v338_v63  ;;  %v343_v14 = vor.u32 %v342_v8, %v341_v1  ;;  %v432_v22 = vshll.u32 %v1059_v54, %v429_v57  ;;  %v433_v25 = vshrl.u32 %v1060_v58, %v430_v12 }
 0x39f   :  { %v348_v15 = vsel %vm344_vm3, %v328_v5, %v331_v9  ;;  %v349_v16 = vsel %vm347_vm6, %v337_v11, 2102212464  ;;  %v352_v17 = vsel %vm344_vm3, %v331_v9, %v334_v10  ;;  %v356_v18 = vsel %vm344_vm3, %v334_v10, %v337_v11 }
 0x3a0   :  { %v350_v19 = vsel %vm346_vm5, %v334_v10, %v349_v16  ;;  %v353_v20 = vsel %vm347_vm6, %v340_v13, 920167782  ;;  %v357_v21 = vsel %vm347_vm6, %v343_v14, 1326507024  ;;  %v435_v26 = vshll.u32 %v1060_v58, %v429_v57 }
 0x3a1   :  { %v354_v23 = vsel %vm346_vm5, %v337_v11, %v353_v20  ;;  %v358_v24 = vsel %vm346_vm5, %v340_v13, %v357_v21  ;;  %v351_v27 = vsel %vm345_vm4, %v348_v15, %v350_v19  ;;  %v436_v30 = vshrl.u32 %v1061_v60, %v430_v12 }
 0x3a2   :  { %v355_v28 = vsel %vm345_vm4, %v352_v17, %v354_v23  ;;  %v359_v29 = vsel %vm345_vm4, %v356_v18, %v358_v24  ;;  %v434_v38 = vor.u32 %v433_v25, %v432_v22  ;;  %v438_v41 = vshll.u32 %v1061_v60, %v429_v57 }
 0x3a3   :  { %v1203_v31 = vmul.u32.u64.low %v1191_v51, %v359_v29  ;;  %v1204_v35 = vmul.u32.u64.high %v1191_v51, %v359_v29, %v1203_v31  ;;  %v1207_v36 = vmul.u32.u64.low %v1191_v51, %v355_v28  ;;  %v1208_v37 = vmul.u32.u64.high %v1191_v51, %v355_v28, %v1207_v36 }
 0x3a4   :  { %v437_v40 = vor.u32 %v436_v30, %v435_v26  ;;  %v439_v42 = vshrl.u32 %v1062_v62, %v430_v12  ;;  %v441_v43 = vshll.u32 %v1062_v62, %v429_v57  ;;  %v442_v44 = vshrl.u32 %v1063_v0, %v430_v12 }
 0x3a5   :  { %v445_v45 = vshrl.u32 %v1064_v7, %v430_v12  ;;  %v367_v47 = vmul.u32 %v1191_v51, %v351_v27  ;;  %v431_v48 = vshrl.u32 %v1059_v54, %v430_v12  ;;  %v444_v50 = vshll.u32 %v1063_v0, %v429_v57 }
 0x3a6   :  { %v440_v49 = vor.u32 %v439_v42, %v438_v41  ;;  %vm369_vm7 = vc.u32 %v1204_v35, %v1207_v36  ;;  %v370_v53 = vadd.s32 1, %v1208_v37  ;;  %v443_v55 = vor.u32 %v442_v44, %v441_v43 }
 0x3a7   :  { %vm447_vm8 = vcmp.lt.s32.totalorder %v1194_v56, 1  ;;  %v446_v58 = vor.u32 %v445_v45, %v444_v50  ;;  %vm449_vm9 = vcmp.lt.s32.totalorder %v1194_v56, 3  ;;  %vm450_vm10 = vcmp.lt.s32.totalorder %v1194_v56, 4 }
 0x3a8   :  { %v455_v59 = vsel %vm447_vm8, %v434_v38, %v437_v40  ;;  %v371_v52 = vsel %vm369_vm7, %v370_v53, %v1208_v37  ;;  %v452_v60 = vsel %vm450_vm10, %v440_v49, 2102212464  ;;  %v456_v51 = vsel %vm450_vm10, %v443_v55, 920167782 }
 0x3a9   :  { %v459_v54 = vsel %vm447_vm8, %v437_v40, %v440_v49  ;;  %v372_v61 = vadd.s32 %v371_v52, %v367_v47  ;;  %vm448_vm11 = vcmp.lt.s32.totalorder %v1194_v56, 2  ;;  %v457_v57 = vsel %vm449_vm9, %v440_v49, %v456_v51 }
 0x3aa   :  { %v460_v62 = vsel %vm450_vm10, %v446_v58, 1326507024  ;;  %v451_v63 = vsel %vm447_vm8, %v431_v48, %v434_v38  ;;  %v453_v0 = vsel %vm449_vm9, %v437_v40, %v452_v60  ;;  %v458_v1 = vsel %vm448_vm11, %v455_v59, %v457_v57 }
 0x3ab   :  { %v461_v2 = vsel %vm449_vm9, %v443_v55, %v460_v62  ;;  %v373_v3 = vadd.s32 536870912, %v372_v61  ;;  %v1218_v5 = vmul.u32.u64.low %v463_v46, %v458_v1  ;;  %v1219_v6 = vmul.u32.u64.high %v463_v46, %v458_v1, %v1218_v5 }
 0x3ac   :  { %v462_v4 = vsel %vm448_vm11, %v459_v54, %v461_v2  ;;  %v454_v10 = vsel %vm448_vm11, %v451_v63, %v453_v0  ;;  %v368_v26 = vadd.s32 %v1207_v36, %v1204_v35  ;;  %vm404_vm7 = vweird.f32 %v1177_v32 }
 0x3ad   :  { %v1221_v7 = vmul.u32.u64.low %v463_v46, %v462_v4  ;;  %v1222_v8 = vmul.u32.u64.high %v463_v46, %v462_v4, %v1221_v7  ;;  %v374_v9 = vshrl.u32 %v373_v3, 30  ;;  %v473_v12 = vadd.s32 1, %v1219_v6 }
 0x3ae   :  { %v470_v56 = vmul.u32 %v463_v46, %v454_v10 }
 0x3af   :  { %v375_v11 = vshll.u32 %v374_v9, 30  ;;  %vm472_vm12 = vc.u32 %v1222_v8, %v1218_v5  ;;  %v471_v47 = vadd.s32 %v1218_v5, %v1222_v8  ;;  %v398_v60 = vsub.s32 4, %v374_v9 }
 0x3b0   :  { %v474_v14 = vsel %vm472_vm12, %v473_v12, %v1219_v6 }
 0x3b1   :  { %v376_v13 = vsub.s32 %v372_v61, %v375_v11  ;;  %v475_v15 = vadd.s32 %v474_v14, %v470_v56  ;;  %v399_v62 = vsel %vm314_vm15, %v398_v60, %v374_v9 }
 0x3b2   :  { %v401_v1 = vsel %vm313_vm0, 0, %v399_v62 }
 0x3b3   :  { %v378_v16 = vsub.s32 0, %v376_v13  ;;  %v476_v17 = vadd.s32 536870912, %v475_v15  ;;  %v611_v5 = vadd.s32 3, %v401_v1  ;;  %v405_v9 = vand.u32 3, %v401_v1 }
 0x3b5   :  { %v800_v18 = vmin.u32 %v378_v16, %v376_v13  ;;  %v477_v19 = vshrl.u32 %v476_v17, 30  ;;  %v612_v10 = vand.u32 3, %v611_v5  ;;  %vm407_vm3 = vcmp.eq.s32.totalorder %v405_v9, 0 }
 0x3b6   :  { %vm410_vm4 = vcmp.eq.s32.totalorder %v405_v9, 2  ;;  %vm406_vm8 = vcmp.lt.s32.totalorder %v405_v9, 2 }
 0x3b7   :  { %v380_v20 = vclz %v800_v18  ;;  %v478_v21 = vshll.u32 %v477_v19, 30  ;;  %v501_v63 = vsub.s32 4, %v477_v19  ;;  %vm614_vm5 = vcmp.eq.s32.totalorder %v612_v10, 0 }
 0x3b8   :  { %vm617_vm6 = vcmp.eq.s32.totalorder %v612_v10, 2  ;;  %vm613_vm9 = vcmp.lt.s32.totalorder %v612_v10, 2 }
 0x3b9   :  { %v801_v22 = vadd.s32 4294967294, %v380_v20  ;;  %v479_v23 = vsub.s32 %v475_v15, %v478_v21  ;;  %v502_v3 = vsel %vm417_vm1, %v501_v63, %v477_v19  ;;  %v734_v15 = vlaneseq }
 0x3ba   :  { %v504_v6 = vsel %vm416_vm2, 0, %v502_v3 }
 0x3bb   :  { %vm802_vm13 = vcmp.lt.s32.totalorder %v801_v22, 0  ;;  %v481_v25 = vsub.s32 0, %v479_v23  ;;  %v715_v11 = vadd.s32 3, %v504_v6  ;;  %v508_v39 = vand.u32 3, %v504_v6 }
 0x3bc   :  { %v383_v24 = vsel %vm802_vm13, 0, %v801_v22 }
 0x3bd   :  { %v384_v27 = vsub.s32 32, %v383_v24  ;;  %v388_v28 = vsub.s32 4294967266, %v383_v24  ;;  %v804_v29 = vmin.u32 %v481_v25, %v479_v23  ;;  %v385_v30 = vshll.u32 %v376_v13, %v383_v24 }
 0x3be   :  { %v1065_v13 = vmov 1966171168   ;;  %v716_v16 = vand.u32 3, %v715_v11  ;;  %vm509_vm10 = vcmp.lt.s32.totalorder %v508_v39, 2  ;;  %vm510_vm11 = vcmp.eq.s32.totalorder %v508_v39, 0 }
 0x3bf   :  { %v386_v31 = vshrl.u32 %v368_v26, %v384_v27  ;;  %v389_v37 = vadd.s32 127, %v388_v28  ;;  %v483_v38 = vclz %v804_v29  ;;  %v732_v14 = vunpack.c.l.s4 %v1065_v13 }
 0x3c0   :  { %vm513_vm12 = vcmp.eq.s32.totalorder %v508_v39, 2  ;;  %vm721_vm13 = vcmp.eq.s32.totalorder %v716_v16, 2 }
 0x3c1   :  { %v387_v40 = vor.u32 %v386_v31, %v385_v30  ;;  %v390_v41 = vshll.u32 %v389_v37, 23  ;;  %v805_v42 = vadd.s32 4294967294, %v483_v38  ;;  %v733_v21 = vunpack.c.0.s8 %v732_v14 }
 0x3c3   :  { %v391_v43 = vor.u32 4788187, %v390_v41  ;;  %vm806_vm14 = vcmp.lt.s32.totalorder %v805_v42, 0  ;;  %v394_v45 = vcvt.s32.f32 %v387_v40 }
 0x3c4   :  { %v486_v46 = vsel %vm806_vm14, 0, %v805_v42  ;;  %vm717_vm14 = vcmp.lt.s32.totalorder %v716_v16, 2 }
 0x3c5   :  { %v392_v44 = vand.u32 2147483647, %v391_v43  ;;  %v487_v48 = vsub.s32 32, %v486_v46  ;;  %v491_v49 = vsub.s32 4294967266, %v486_v46  ;;  %v488_v36 = vshll.u32 %v479_v23, %v486_v46 }
 0x3c6   :  { %v735_v23 = vshrl.u32 %v734_v15, 7 }
 0x3c7   :  { %v395_v35 = vmul.f32 %v394_v45, %v392_v44  ;;  %v489_v50 = vshrl.u32 %v471_v47, %v487_v48  ;;  %v492_v53 = vadd.s32 127, %v491_v49 }
 0x3c8   :  { %v736_v43 = vsub.s32 %v733_v21, %v735_v23 }
 0x3c9   :  { %v396_v55 = vxor.u32 2147483648, %v395_v35  ;;  %v490_v58 = vor.u32 %v489_v50, %v488_v36  ;;  %v493_v59 = vshll.u32 %v492_v53, 23 }
 0x3cb   :  { %v397_v52 = vsel %vm314_vm15, %v396_v55, %v395_v35  ;;  %v494_v54 = vor.u32 4788187, %v493_v59  ;;  %v497_v57 = vcvt.s32.f32 %v490_v58  ;;  %vm718_vm15 = vcmp.eq.s32.totalorder %v716_v16, 0  ;;  %v726_v35 = vld [vmem:[%s1270_s8] sm:$0x3] }
 0x3cc   :  { %v400_v51 = vsel %vm313_vm0, %v1177_v32, %v397_v52  ;;  %vm507_vm0 = vweird.f32 %v1179_v33  ;;  %v727_v32 = vld [vmem:[%s1271_s9] sm:$0x3] }
 0x3cd   :  { %996 = vcosq.f32 %v400_v51  ;;  %v495_v61 = vand.u32 2147483647, %v494_v54 }
 0x3ce   :  { %998 = vsinq.f32 %v400_v51 }
 0x3cf   :  { %v498_v0 = vmul.f32 %v497_v57, %v495_v61 }
 0x3d1   :  { %v499_v2 = vxor.u32 2147483648, %v498_v0 }
 0x3d3   :  { %v500_v34 = vsel %vm417_vm1, %v499_v2, %v498_v0  ;;  %vm769_vm1 = vcmp.lt.s32.totalorder %v734_v15, 256 }
 0x3d4   :  { %v503_v4 = vsel %vm416_vm2, %v1179_v33, %v500_v34 }
 0x3d5   :  { %1000 = vcosq.f32 %v503_v4 }
 0x3d6   :  { %1002 = vsinq.f32 %v503_v4 }
 0x3d7   :  { %v997_v7 = vpop.eup %996 }
 0x3d8   :  { %v999_v8 = vpop.eup %998  ;;  %v411_v56 = vxor.u32 2147483648, %v997_v7 }
 0x3d9   :  { %v408_v12 = vxor.u32 2147483648, %v999_v8 }
 0x3da   :  { %v412_v18 = vsel %vm410_vm4, %v411_v56, %v999_v8  ;;  %v619_v20 = vsel %vm617_vm6, %v411_v56, %v999_v8 }
 0x3db   :  { %v409_v17 = vsel %vm407_vm3, %v997_v7, %v408_v12  ;;  %v616_v19 = vsel %vm614_vm5, %v997_v7, %v408_v12 }
 0x3dc   :  { %v413_v25 = vsel %vm406_vm8, %v409_v17, %v412_v18  ;;  %v620_v27 = vsel %vm613_vm9, %v616_v19, %v619_v20 }
 0x3dd   :  { %v414_v31 = vsel %vm404_vm7, nan, %v413_v25  ;;  %v621_v38 = vsel %vm404_vm7, nan, %v620_v27 }
 0x3df   :  { %v1001_v22 = vpop.eup %1000 }
 0x3e0   :  { %v1003_v24 = vpop.eup %1002  ;;  %v514_v26 = vxor.u32 2147483648, %v1001_v22 }
 0x3e1   :  { %v511_v28 = vxor.u32 2147483648, %v1003_v24 }
 0x3e2   :  { %v515_v29 = vsel %vm513_vm12, %v514_v26, %v1003_v24  ;;  %v723_v30 = vsel %vm721_vm13, %v514_v26, %v1003_v24 }
 0x3e3   :  { %v512_v37 = vsel %vm510_vm11, %v1001_v22, %v511_v28  ;;  %v720_v40 = vsel %vm718_vm15, %v1001_v22, %v511_v28 }
 0x3e4   :  { %v516_v41 = vsel %vm509_vm10, %v512_v37, %v515_v29  ;;  %v724_v42 = vsel %vm717_vm14, %v720_v40, %v723_v30 }
 0x3e5   :  { %v517_v44 = vsel %vm507_vm0, nan, %v516_v41  ;;  %v725_v45 = vsel %vm507_vm0, nan, %v724_v42 }
 0x3e6   :  { %v730_v46 = vcombine.low %v414_v31, %v517_v44  ;;  %v749_v47 = vcombine.low %v621_v38, %v725_v45 }
 0x3e8   :  { %v737_v48 = vrot.slane %v730_v46, %v736_v43  ;;  %v756_v49 = vrot.slane %v749_v47, %v736_v43 }
 0x3ea   :  { %v744_v36 = vrot.slane %v737_v48, %v736_v43  ;;  %v763_v33 = vrot.slane %v756_v49, %v736_v43 }
 0x3ec   :  { %v746_v50 = vmul.f32 %v744_v36, %v726_v35  ;;  %v765_v53 = vmul.f32 %v763_v33, %v727_v32  ;;  %v772_v55 = vmul.f32 %v763_v33, %v726_v35  ;;  %v773_v58 = vmul.f32 %v744_v36, %v727_v32 }
 0x3ee   :  { %v766_v59 = vsub.f32 %v746_v50, %v765_v53  ;;  %v774_v52 = vadd.f32 %v773_v58, %v772_v55 }
 0x3f0   :  { %771 = vst.msk [vmem:[#allocation6] ss:$2 sm:$0x3] %vm769_vm1, %v766_v59  ;;  %776 = vst.msk [vmem:[#allocation6 + $0x1] ss:$2 sm:$0x3] %vm769_vm1, %v774_v52 }
 0x3f1   :  { %1037 = shalt.err (!%p1034_p12)
}
 0x3f2   :  { %s1038_s6 = scalar_lea.hbm %s1272_s10, 64 }
 0x3f3   :  { %p1039_p13 = scmp.ne.s32.totalorder %s1272_s10, %s1038_s6  ;;  %p1042_p0 = scmp.lt.u32.totalorder %s1038_s6, %s1272_s10 }
 0x3f5   :  { %p1044_p1 = pnand %p1042_p0, %p1039_p13 }
 0x3f7   :  { %1047 = shalt.err (!%p1044_p1)
}
 0x3f8   :  { %786 = dma.vmem_to_hbm [thread:$0]  %s784_s22, 64, %s1272_s10, [#allocation5]  }
 0x3f9   :  { %1050 = dma.done.wait [#allocation5], 64  }
 0x3fa   :  { %1051 = vsyncadd [#allocation5], 4294967232 }
 0x3fb   :  { %790 = vsyncpa [#allocation4], 1 }
 0x3fc   :  { %791 = vsyncpa [#allocation5], 1 }

</bundles_post_ra>
